<compile_context>
chip_gen: v5e
topology: v5e:2x2
jax: 0.10.0
libtpu: 0.0.40
codegen_flags: <defaults>
</compile_context>

<pallas_src>
import math
import functools

import jax
import jax.numpy as jnp
from jax import lax
from jax.experimental import pallas as pl
from jax.experimental.pallas import tpu as pltpu

_NEG_INF = -1e30


def _pick_tile(dim, candidates):
    """Largest candidate tile that evenly divides `dim`, else the full dim.

    Note: falling back to the full dim is always a legal block shape; for the
    real GPT shapes (T, C multiples of 128) a proper tile is always found.
    """
    for c in candidates:
        if c <= dim and dim % c == 0:
            return c
    return dim


# ---------------------------------------------------------------------------
# Fused linear:  y = x @ W + b     (x: (M, K), W: (K, N), b: (N,))
# Used for the c_attn projection.
# ---------------------------------------------------------------------------
def _linear_kernel(x_ref, w_ref, b_ref, o_ref, acc_ref):
    k = pl.program_id(2)

    @pl.when(k == 0)
    def _init():
        acc_ref[...] = jnp.zeros(acc_ref.shape, acc_ref.dtype)

    acc_ref[...] += jnp.dot(x_ref[...], w_ref[...],
                            preferred_element_type=jnp.float32)

    @pl.when(k == pl.num_programs(2) - 1)
    def _finalize():
        o_ref[...] = (acc_ref[...] + b_ref[...]).astype(o_ref.dtype)


def _linear(x2d, w, b):
    M, K = x2d.shape
    K2, N = w.shape
    assert K == K2
    # 256-aligned operand tiles keep the v6e/v7x 2x256x256 MXU full; tm up to 512
    # halves W re-reads across M.  Footprint (<~8 MB f32) fits default scoped VMEM
    # on all generations (16 MiB v5e / 32 MiB v6e,v7x).
    tm = _pick_tile(M, (512, 256, 128))
    tn = _pick_tile(N, (512, 256, 128))
    tk = _pick_tile(K, (512, 256, 128))

    return pl.pallas_call(
        _linear_kernel,
        out_shape=jax.ShapeDtypeStruct((M, N), x2d.dtype),
        grid_spec=pltpu.PrefetchScalarGridSpec(
            num_scalar_prefetch=0,
            grid=(M // tm, N // tn, K // tk),
            in_specs=[
                pl.BlockSpec((tm, tk), lambda i, j, kk: (i, kk)),   # x
                pl.BlockSpec((tk, tn), lambda i, j, kk: (kk, j)),   # W (in, out)
                pl.BlockSpec((1, tn), lambda i, j, kk: (0, j)),     # bias
            ],
            out_specs=pl.BlockSpec((tm, tn), lambda i, j, kk: (i, j)),
            scratch_shapes=[pltpu.VMEM((tm, tn), jnp.float32)],
        ),
        compiler_params=pltpu.CompilerParams(
            dimension_semantics=("parallel", "parallel", "arbitrary")),
    )(x2d, w, b.reshape(1, -1))


# ---------------------------------------------------------------------------
# Flash attention (causal) over (B*H, T, hd) tensors.
# ---------------------------------------------------------------------------
def _flash_kernel(q_ref, k_ref, v_ref, o_ref, m_sc, l_sc, acc_sc, qs_sc,
                  *, tq, tkv, scale, approx_recip):
    qi = pl.program_id(1)
    ki = pl.program_id(2)

    @pl.when(ki == 0)
    def _init():
        m_sc[...] = jnp.full(m_sc.shape, _NEG_INF, m_sc.dtype)
        l_sc[...] = jnp.zeros(l_sc.shape, l_sc.dtype)
        acc_sc[...] = jnp.zeros(acc_sc.shape, acc_sc.dtype)
        # q block is resident across the KV axis: fold 1/sqrt(hd) in once, reuse.
        qs_sc[...] = (q_ref[0] * scale).astype(qs_sc.dtype)

    q_start = qi * tq
    k_start = ki * tkv
    q_last = q_start + (tq - 1)
    block_needed = k_start <= q_last                     # skip fully-masked blocks
    needs_mask = (k_start + (tkv - 1)) > q_start         # only diagonal blocks masked

    def _attend(masked):
        q = qs_sc[...]                                   # pre-scaled, input dtype
        k = k_ref[0]
        v = v_ref[0]

        # QK^T: contract last dims directly — no explicit transpose of k.
        s = lax.dot_general(q, k, (((1,), (1,)), ((), ())),
                            preferred_element_type=jnp.float32)   # (tq, tkv) f32

        if masked:
            row = q_start + lax.broadcasted_iota(jnp.int32, (tq, tkv), 0)
            col = k_start + lax.broadcasted_iota(jnp.int32, (tq, tkv), 1)
            s = jnp.where(row >= col, s, _NEG_INF)

        m_prev = m_sc[...]
        m_new = jnp.maximum(m_prev, jnp.max(s, axis=-1, keepdims=True))
        alpha = jnp.exp(m_prev - m_new)
        p = jnp.exp(s - m_new)
        l_sc[...] = alpha * l_sc[...] + jnp.sum(p, axis=-1, keepdims=True)
        acc_sc[...] = alpha * acc_sc[...] + jnp.dot(
            p.astype(v.dtype), v, preferred_element_type=jnp.float32)
        m_sc[...] = m_new

    @pl.when(jnp.logical_and(block_needed, needs_mask))
    def _diag():
        _attend(True)

    @pl.when(jnp.logical_and(block_needed, jnp.logical_not(needs_mask)))
    def _full():
        _attend(False)

    @pl.when(ki == pl.num_programs(2) - 1)
    def _finalize():
        inv_l = pl.reciprocal(l_sc[...], approx=approx_recip)
        o_ref[0] = (acc_sc[...] * inv_l).astype(o_ref.dtype)


def _flash_attention(q, k, v):
    """q, k, v: (B*H, T, hd) -> (B*H, T, hd)."""
    BH, T, hd = q.shape
    scale = 1.0 / math.sqrt(hd)
    # tq >= tkv: K/V HBM bytes scale as T/tq (bigger tq halves them) and the
    # diagonal-block classification stays tight.
    tq = _pick_tile(T, (512, 256, 128))
    tkv = _pick_tile(T, (256, 128))
    approx = (q.dtype == jnp.bfloat16)   # keep exact reciprocal on the f32 path

    def kv_index_map(b, qi, ki):
        # Clamp fully-masked (future) KV blocks onto the last needed block so
        # consecutive skipped iterations alias the same block index and Pallas
        # elides their HBM->VMEM copies (compute is already gated by pl.when).
        last_needed = (qi * tq + (tq - 1)) // tkv
        return (b, jnp.minimum(ki, last_needed), 0)

    kernel = functools.partial(_flash_kernel, tq=tq, tkv=tkv,
                               scale=scale, approx_recip=approx)
    return pl.pallas_call(
        kernel,
        out_shape=jax.ShapeDtypeStruct((BH, T, hd), q.dtype),
        grid_spec=pltpu.PrefetchScalarGridSpec(
            num_scalar_prefetch=0,
            grid=(BH, T // tq, T // tkv),
            in_specs=[
                pl.BlockSpec((1, tq, hd), lambda b, qi, ki: (b, qi, 0)),   # q
                pl.BlockSpec((1, tkv, hd), kv_index_map),                  # k
                pl.BlockSpec((1, tkv, hd), kv_index_map),                  # v
            ],
            out_specs=pl.BlockSpec((1, tq, hd), lambda b, qi, ki: (b, qi, 0)),
            scratch_shapes=[
                pltpu.VMEM((tq, 1), jnp.float32),    # running max m
                pltpu.VMEM((tq, 1), jnp.float32),    # running denom l
                pltpu.VMEM((tq, hd), jnp.float32),   # output accumulator
                pltpu.VMEM((tq, hd), q.dtype),       # pre-scaled q (hoisted)
            ],
        ),
        compiler_params=pltpu.CompilerParams(
            dimension_semantics=("parallel", "parallel", "arbitrary")),
    )(q, k, v)


# ---------------------------------------------------------------------------
# Output projection with the head-merge fused in.
#   y_bh: (B*H, T, hd)  (flash layout, head-major rows)
#   out[b, t, :] = sum_h y_bh[b*H+h, t, :] @ W[h*hd:(h+1)*hd, :] + bias
# Grid (B, T//tm, C//tn, H); heads are the trailing "arbitrary" reduction axis
# and the output block stays resident across it.  This removes the XLA
# (B,H,T,hd) -> (B,T,C) transpose (a full extra HBM round trip) entirely.
# ---------------------------------------------------------------------------
def _proj_kernel(y_ref, w_ref, b_ref, o_ref, acc_ref):
    h = pl.program_id(3)

    @pl.when(h == 0)
    def _init():
        acc_ref[...] = jnp.zeros(acc_ref.shape, acc_ref.dtype)

    acc_ref[...] += jnp.dot(y_ref[0], w_ref[...],
                            preferred_element_type=jnp.float32)

    @pl.when(h == pl.num_programs(3) - 1)
    def _finalize():
        o_ref[0] = (acc_ref[...] + b_ref[...]).astype(o_ref.dtype)


def _proj_heads_fused(y_bh, w, b, *, B, H):
    BH, T, hd = y_bh.shape
    C, N = w.shape
    assert BH == B * H and C == H * hd
    tm = _pick_tile(T, (512, 256, 128))
    tn = _pick_tile(N, (512, 256, 128))

    return pl.pallas_call(
        _proj_kernel,
        out_shape=jax.ShapeDtypeStruct((B, T, N), y_bh.dtype),
        grid_spec=pltpu.PrefetchScalarGridSpec(
            num_scalar_prefetch=0,
            grid=(B, T // tm, N // tn, H),
            in_specs=[
                # y block read directly from the flash layout, indexed by head.
                pl.BlockSpec((1, tm, hd), lambda b, i, j, h: (b * H + h, i, 0)),
                # W_proj row-block for head h (hd is a multiple of 8 -> legal sublane tile).
                pl.BlockSpec((hd, tn), lambda b, i, j, h: (h, j)),
                pl.BlockSpec((1, tn), lambda b, i, j, h: (0, j)),
            ],
            out_specs=pl.BlockSpec((1, tm, tn), lambda b, i, j, h: (b, i, j)),
            scratch_shapes=[pltpu.VMEM((tm, tn), jnp.float32)],
        ),
        compiler_params=pltpu.CompilerParams(
            dimension_semantics=("parallel", "parallel", "parallel", "arbitrary")),
    )(y_bh, w, b.reshape(1, -1))


# ---------------------------------------------------------------------------
# Full module forward.
# ---------------------------------------------------------------------------
def causal_self_attention(x, w_attn, b_attn, w_proj, b_proj, *, n_head):
    """x: (B, T, C). w_attn: (C, 3C), b_attn: (3C,), w_proj: (C, C), b_proj: (C,)."""
    B, T, C = x.shape
    H = n_head
    assert C % H == 0
    hd = C // H

    # 1) qkv projection
    qkv = _linear(x.reshape(B * T, C), w_attn, b_attn)          # (B*T, 3C)

    # head split (layout plumbing; hd is generally < 128 lanes so a direct
    # column-sliced BlockSpec on the (B*T, 3C) buffer is not lane-legal).
    # TODO(synk): fold the q/k/v head-split into the c_attn out_specs when hd % 128 == 0.
    qkv = qkv.reshape(B, T, 3, H, hd).transpose(2, 0, 3, 1, 4)  # (3, B, H, T, hd)
    q = qkv[0].reshape(B * H, T, hd)
    k = qkv[1].reshape(B * H, T, hd)
    v = qkv[2].reshape(B * H, T, hd)

    # 2) causal flash attention
    y = _flash_attention(q, k, v)                               # (B*H, T, hd)

    # 3) output projection with head-merge fused (no XLA transpose of y)
    return _proj_heads_fused(y, w_proj, b_proj, B=B, H=H)       # (B, T, C)


def reference(x, w_attn, b_attn, w_proj, b_proj, *, n_head):
    """Plain-JAX reference matching torch F.scaled_dot_product_attention(is_causal=True)."""
    B, T, C = x.shape
    hd = C // n_head
    qkv = x @ w_attn + b_attn
    q, k, v = jnp.split(qkv, 3, axis=-1)

    def to_heads(t):
        return t.reshape(B, T, n_head, hd).transpose(0, 2, 1, 3)

    q, k, v = to_heads(q), to_heads(k), to_heads(v)
    s = jnp.einsum("bhqd,bhkd->bhqk", q, k) / math.sqrt(hd)
    mask = jnp.tril(jnp.ones((T, T), dtype=bool))
    s = jnp.where(mask, s, -jnp.inf)
    p = jax.nn.softmax(s, axis=-1)
    y = jnp.einsum("bhqk,bhkd->bhqd", p, v)
    y = y.transpose(0, 2, 1, 3).reshape(B, T, C)
    return y @ w_proj + b_proj


if __name__ == "__main__":
    # Small shapes consistent with the module (toy C=32 < 128 lanes means partial
    # stores here; real GPT C (multiple of 128) is lane-dense).
    B, T, C, n_head = 2, 16, 32, 4

    key = jax.random.PRNGKey(0)
    kx, k1, k2, k3, k4 = jax.random.split(key, 5)

    x = jax.random.normal(kx, (B, T, C), dtype=jnp.float32)
    # nn.Linear(n_embd, 3*n_embd) has weight (3C, C); stored pre-transposed (C, 3C).
    w_attn = jax.random.normal(k1, (C, 3 * C), dtype=jnp.float32) * 0.02
    b_attn = jax.random.normal(k2, (3 * C,), dtype=jnp.float32) * 0.02
    w_proj = jax.random.normal(k3, (C, C), dtype=jnp.float32) * 0.02
    b_proj = jax.random.normal(k4, (C,), dtype=jnp.float32) * 0.02

    # f32 path (tight check against plain-JAX reference)
    out = causal_self_attention(x, w_attn, b_attn, w_proj, b_proj, n_head=n_head)
    out = jax.block_until_ready(out)
    ref = reference(x, w_attn, b_attn, w_proj, b_proj, n_head=n_head)
    assert out.shape == (B, T, C)
    assert jnp.allclose(out, ref, atol=1e-4, rtol=1e-4), "f32 mismatch vs reference"

    # bf16 path (bf16 MXU operands with f32 accumulation; loose tolerance)
    out_bf16 = causal_self_attention(
        x.astype(jnp.bfloat16),
        w_attn.astype(jnp.bfloat16), b_attn.astype(jnp.bfloat16),
        w_proj.astype(jnp.bfloat16), b_proj.astype(jnp.bfloat16),
        n_head=n_head)
    out_bf16 = jax.block_until_ready(out_bf16)
    assert jnp.allclose(out_bf16.astype(jnp.float32), ref, atol=5e-2, rtol=5e-2), \
        "bf16 mismatch vs reference"

    print("KERNEL_OK")
</pallas_src>

<mosaic_0001>
module attributes {stable_mosaic.version = 11 : i64} {
  func.func @_linear_kernel(%arg0: i32, %arg1: i32, %arg2: i32, %arg3: memref<32x32xf32, #tpu.memory_space<vmem>>, %arg4: memref<32x96xf32, #tpu.memory_space<vmem>>, %arg5: memref<1x96xf32, #tpu.memory_space<vmem>>, %arg6: memref<32x96xf32, #tpu.memory_space<vmem>>, %arg7: memref<32x96xf32, #tpu.memory_space<vmem>>) attributes {dimension_semantics = [#tpu.dimension_semantics<parallel>, #tpu.dimension_semantics<parallel>, #tpu.dimension_semantics<arbitrary>], iteration_bounds = array<i64: 1, 1, 1>, scalar_prefetch = 0 : i64, scratch_operands = 1 : i64, tpu.core_type = #tpu.core_type<tc>, window_params = [{transform_indices = @transform_0, window_bounds = array<i64: 32, 32>}, {transform_indices = @transform_1, window_bounds = array<i64: 32, 96>}, {transform_indices = @transform_2, window_bounds = array<i64: 1, 96>}, {transform_indices = @transform_3, window_bounds = array<i64: 32, 96>}]} {
    %c0_i32 = arith.constant 0 : i32
    %0 = arith.cmpi eq, %arg2, %c0_i32 : i32
    %1 = arith.extui %0 : i1 to i32
    %c0_i32_0 = arith.constant 0 : i32
    %2 = arith.cmpi ne, %1, %c0_i32_0 : i32
    scf.if %2 {
      %cst_10 = arith.constant 0.000000e+00 : f32
      %12 = vector.broadcast %cst_10 : f32 to vector<32x96xf32>
      %c0_11 = arith.constant 0 : index
      %c0_12 = arith.constant 0 : index
      %13 = vector.load %arg7[%c0_11, %c0_12] : memref<32x96xf32, #tpu.memory_space<vmem>>, vector<32x96xf32>
      tpu.vector_store %arg7[%c0_11, %c0_12], %12 {strides = array<i32>} : memref<32x96xf32, #tpu.memory_space<vmem>>, vector<32x96xf32>,
    } else {
    }
    %c0 = arith.constant 0 : index
    %c0_1 = arith.constant 0 : index
    %3 = vector.load %arg7[%c0, %c0_1] : memref<32x96xf32, #tpu.memory_space<vmem>>, vector<32x96xf32>
    %c0_2 = arith.constant 0 : index
    %c0_3 = arith.constant 0 : index
    %4 = vector.load %arg3[%c0_2, %c0_3] : memref<32x32xf32, #tpu.memory_space<vmem>>, vector<32x32xf32>
    %c0_4 = arith.constant 0 : index
    %c0_5 = arith.constant 0 : index
    %5 = vector.load %arg4[%c0_4, %c0_5] : memref<32x96xf32, #tpu.memory_space<vmem>>, vector<32x96xf32>
    %cst = arith.constant dense<0.000000e+00> : vector<32x96xf32>
    %6 = tpu.matmul %4, %5, %cst {dimension_numbers = #tpu.dot_dimension_numbers<[1], [0], [0], [1], [0, 0, 1, 1], [], []>} : vector<32x32xf32>, vector<32x96xf32>, vector<32x96xf32> -> vector<32x96xf32>
    %7 = arith.addf %3, %6 : vector<32x96xf32>
    %c0_6 = arith.constant 0 : index
    %c0_7 = arith.constant 0 : index
    %8 = vector.load %arg7[%c0_6, %c0_7] : memref<32x96xf32, #tpu.memory_space<vmem>>, vector<32x96xf32>
    tpu.vector_store %arg7[%c0_6, %c0_7], %7 {strides = array<i32>} : memref<32x96xf32, #tpu.memory_space<vmem>>, vector<32x96xf32>,
    %c0_i32_8 = arith.constant 0 : i32
    %9 = arith.cmpi eq, %arg2, %c0_i32_8 : i32
    %10 = arith.extui %9 : i1 to i32
    %c0_i32_9 = arith.constant 0 : i32
    %11 = arith.cmpi ne, %10, %c0_i32_9 : i32
    scf.if %11 {
      %c0_10 = arith.constant 0 : index
      %c0_11 = arith.constant 0 : index
      %12 = vector.load %arg7[%c0_10, %c0_11] : memref<32x96xf32, #tpu.memory_space<vmem>>, vector<32x96xf32>
      %c0_12 = arith.constant 0 : index
      %c0_13 = arith.constant 0 : index
      %13 = vector.load %arg5[%c0_12, %c0_13] : memref<1x96xf32, #tpu.memory_space<vmem>>, vector<1x96xf32>
      %14 = vector.broadcast %13 : vector<1x96xf32> to vector<32x96xf32>
      %15 = arith.addf %12, %14 : vector<32x96xf32>
      %c0_14 = arith.constant 0 : index
      %c0_15 = arith.constant 0 : index
      %16 = vector.load %arg6[%c0_14, %c0_15] : memref<32x96xf32, #tpu.memory_space<vmem>>, vector<32x96xf32>
      tpu.vector_store %arg6[%c0_14, %c0_15], %15 {strides = array<i32>} : memref<32x96xf32, #tpu.memory_space<vmem>>, vector<32x96xf32>,
    } else {
    }
    return
  }
  func.func @transform_0(%arg0: i32, %arg1: i32, %arg2: i32) -> (i32, i32) {
    %c0_i32 = arith.constant 0 : i32
    return %arg0, %arg2 : i32, i32
  }
  func.func @transform_1(%arg0: i32, %arg1: i32, %arg2: i32) -> (i32, i32) {
    %c0_i32 = arith.constant 0 : i32
    return %arg2, %arg1 : i32, i32
  }
  func.func @transform_2(%arg0: i32, %arg1: i32, %arg2: i32) -> (i32, i32) {
    %c0_i32 = arith.constant 0 : i32
    %c0_i32_0 = arith.constant 0 : i32
    return %c0_i32, %arg1 : i32, i32
  }
  func.func @transform_3(%arg0: i32, %arg1: i32, %arg2: i32) -> (i32, i32) {
    %c0_i32 = arith.constant 0 : i32
    return %arg0, %arg1 : i32, i32
  }
}

</mosaic_0001>

<bundles_post_ra>
// kernel: tpu_custom_call.1
= control target key start
LH: loop header
LB: loop body
LE: loop exit
PB: predicated region body
PF: predicated region fallthrough
CT: control target
= control target key end

     0   :  { %8 = vsyncpa [#allocation4], 0  ;;  %s318_s0 = inlined_call_operand.hbm [shape: f32[32,32], index: 0, kind: input, shape index: {}]   ;;  %s319_s1 = inlined_call_operand.hbm [shape: f32[32,96], index: 1, kind: input, shape index: {}]   ;;  %s320_s2 = inlined_call_operand.vmem [shape: f32[1,96], index: 2, kind: input, shape index: {}]   ;;  %s321_s3 = inlined_call_operand.hbm [shape: f32[32,96], index: 3, kind: output, shape index: {}]  }
   0x1   :  { %9 = vsyncpa [#allocation7], 0 }
   0x2   :  { %10 = vsyncpa [#allocation5], 0  ;;  %s15_s14 = sshll.u32 %s318_s0, 4  ;;  %s259_s15 = smov [#allocation3]   ;;  %s16_s14 = int_to_ptr.hbm [resolvable:$true] %s15_s14 }
   0x3   :  { %s17_s16 = sshll.u32 %s259_s15, 4  ;;  %s28_s19 = sshll.u32 %s319_s1, 4  ;;  %s18_s16 = int_to_ptr.vmem [resolvable:$true] %s17_s16  ;;  %s29_s19 = int_to_ptr.hbm [resolvable:$true] %s28_s19 }
   0x4   :  { %s260_s20 = smov 128   ;;  %s261_s21 = smov 8  }
   0x5   :  { %23 = dma.hbm_to_vmem [thread:$0]  %s16_s14, 512, %s18_s16, [#allocation4], %s260_s20, %s260_s20, %s261_s21  }
   0x6   :  { %s262_s22 = smov [#allocation6]  }
   0x7   :  { %s30_s23 = sshll.u32 %s262_s22, 4  ;;  %s31_s23 = int_to_ptr.vmem [resolvable:$true] %s30_s23 }
   0x8   :  { %36 = dma.hbm_to_vmem [thread:$0]  %s29_s19, 512, %s31_s23, [#allocation7], %s260_s20, %s260_s20, %s261_s21  }
   0x9   :  { %253 = dma.done.wait [#allocation4], 512  }
   0xa   :  { %254 = vsyncadd [#allocation4], 4294966784 }
   0xb   :  { %255 = dma.done.wait [#allocation7], 512  }
   0xc   :  { %256 = vsyncadd [#allocation7], 4294966784  ;;  %vm51_vm0 = vcmask 785408   ;;  %v263_v0 = vmov 0.0   ;;  %v67_v1 = vld [vmem:[#allocation6 + $0x18] sm:$0xff]  ;;  %v66_v2 = vld [vmem:[#allocation6 + $0x10] sm:$0xff] }
   0xd   :  { %52 = vst.msk [vmem:[#allocation2] sm:$0xff] %vm51_vm0, %v263_v0  ;;  %163 = vmatpush.msra.mxu2 %v67_v1  ;;  %164 = vmatpush.msra.mxu3 %v67_v1  ;;  %v65_v3 = vld [vmem:[#allocation6 + $0x8] sm:$0xff]  ;;  %v64_v4 = vld [vmem:[#allocation6] sm:$0xff]  ;;  %v62_v5 = vld [vmem:[#allocation3 + $0x10] sm:$0xff]  ;;  %vm68_vm1 = vcmask 261120   ;;  %s264_s24 = smov [#allocation8]  }
   0xe   :  { %53 = vst.msk [vmem:[#allocation2 + $0x8] sm:$0xff] %vm51_vm0, %v263_v0  ;;  %93 = vmatpush.msra.mxu0 %v67_v1  ;;  %162 = vmatpush.msra.mxu1 %v67_v1  ;;  %v63_v6 = vld [vmem:[#allocation3 + $0x18] sm:$0xff]  ;;  %v60_v7 = vld [vmem:[#allocation3] sm:$0xff]  ;;  %v61_v8 = vld [vmem:[#allocation3 + $0x8] sm:$0xff]  ;;  %s142_s25 = sshll.u32 %s264_s24, 4  ;;  %s144_s28 = sshll.u32 %s321_s3, 4  ;;  %s143_s25 = int_to_ptr.vmem [resolvable:$true] %s142_s25  ;;  %s145_s28 = int_to_ptr.hbm [resolvable:$true] %s144_s28 }
   0xf   :  { %54 = vst.msk [vmem:[#allocation2 + $0x10] sm:$0xff] %vm51_vm0, %v263_v0  ;;  %166 = vmatpush.msra.mxu2 %v66_v2  ;;  %167 = vmatpush.msra.mxu3 %v66_v2  ;;  %v180_v21 = vld [vmem:[%s320_s2] ss:$0 sm:$0xff] }
  0x10   :  { %55 = vst.msk [vmem:[#allocation2 + $0x18] sm:$0xff] %vm51_vm0, %v263_v0  ;;  %94 = vmatpush.msra.mxu0 %v66_v2  ;;  %165 = vmatpush.msra.mxu1 %v66_v2 }
  0x11   :  { %169 = vmatpush.msra.mxu2 %v65_v3  ;;  %170 = vmatpush.msra.mxu3 %v65_v3 }
  0x12   :  { %95 = vmatpush.msra.mxu0 %v65_v3  ;;  %168 = vmatpush.msra.mxu1 %v65_v3 }
  0x13   :  { %172 = vmatpush.msra.mxu2 %v64_v4  ;;  %173 = vmatpush.msra.mxu3 %v64_v4 }
  0x14   :  { %160 = vmatmul.msk.f32.vlgmr.msra.gmra.mxu2 %vm68_vm1, %v62_v5  ;;  %161 = vmatmul.msk.f32.vlgmr.msra.gmra.mxu3 %vm68_vm1, %v63_v6  ;;  %v56_v9 = vld [vmem:[#allocation2] sm:$0xff] }
  0x15   :  { %96 = vmatpush.msra.mxu0 %v64_v4  ;;  %171 = vmatpush.msra.mxu1 %v64_v4  ;;  %v57_v10 = vld [vmem:[#allocation2 + $0x8] sm:$0xff] }
  0x16   :  { %158 = vmatmul.msk.f32.vlgmr.msra.gmra.mxu0 %vm68_vm1, %v60_v7  ;;  %159 = vmatmul.msk.f32.vlgmr.msra.gmra.mxu1 %vm68_vm1, %v61_v8  ;;  %v58_v15 = vld [vmem:[#allocation2 + $0x10] sm:$0xff] }
  0x17   :  { %v59_v16 = vld [vmem:[#allocation2 + $0x18] sm:$0xff] }
  0x93   :  { %v98_v11 = vpop.f32.mrf.mxu0  ;;  %v101_v12 = vpop.f32.mrf.mxu1 }
  0x94   :  { %v110_v13 = vadd.f32 %v98_v11, %v56_v9  ;;  %v111_v14 = vadd.f32 %v101_v12, %v57_v10 }
  0x96   :  { %115 = vst.msk [vmem:[#allocation2] sm:$0xff] %vm51_vm0, %v110_v13 }
  0x97   :  { %116 = vst.msk [vmem:[#allocation2 + $0x8] sm:$0xff] %vm51_vm0, %v111_v14  ;;  %v104_v17 = vpop.f32.mrf.mxu2  ;;  %v107_v18 = vpop.f32.mrf.mxu3 }
  0x98   :  { %v112_v19 = vadd.f32 %v104_v17, %v58_v15  ;;  %v113_v20 = vadd.f32 %v107_v18, %v59_v16 }
  0x9a   :  { %117 = vst.msk [vmem:[#allocation2 + $0x10] sm:$0xff] %vm51_vm0, %v112_v19 }
  0x9b   :  { %118 = vst.msk [vmem:[#allocation2 + $0x18] sm:$0xff] %vm51_vm0, %v113_v20 }
  0x9d   :  { %v122_v22 = vld [vmem:[#allocation2] sm:$0xff] }
  0x9e   :  { %v123_v23 = vld [vmem:[#allocation2 + $0x8] sm:$0xff]  ;;  %v130_v24 = vadd.f32 %v180_v21, %v122_v22 }
  0x9f   :  { %v131_v25 = vadd.f32 %v180_v21, %v123_v23 }
  0xa0   :  { %134 = vst.msk [vmem:[#allocation8] sm:$0xff] %vm51_vm0, %v130_v24 }
  0xa1   :  { %v124_v26 = vld [vmem:[#allocation2 + $0x10] sm:$0xff]  ;;  %135 = vst.msk [vmem:[#allocation8 + $0x8] sm:$0xff] %vm51_vm0, %v131_v25 }
  0xa2   :  { %v125_v27 = vld [vmem:[#allocation2 + $0x18] sm:$0xff]  ;;  %v132_v28 = vadd.f32 %v180_v21, %v124_v26 }
  0xa3   :  { %v133_v29 = vadd.f32 %v180_v21, %v125_v27 }
  0xa4   :  { %136 = vst.msk [vmem:[#allocation8 + $0x10] sm:$0xff] %vm51_vm0, %v132_v28 }
  0xa5   :  { %137 = vst.msk [vmem:[#allocation8 + $0x18] sm:$0xff] %vm51_vm0, %v133_v29 }
  0xa6   :  { %150 = dma.vmem_to_hbm [thread:$0]  %s143_s25, 512, %s145_s28, [#allocation5], %s260_s20, %s260_s20, %s261_s21  }
  0xa7   :  { %257 = dma.done.wait [#allocation5], 512  }
  0xa8   :  { %258 = vsyncadd [#allocation5], 4294966784 }
  0xa9   :  { %155 = vsyncpa [#allocation4], 1 }
  0xaa   :  { %156 = vsyncpa [#allocation7], 1 }
  0xab   :  { %157 = vsyncpa [#allocation5], 1 }

</bundles_post_ra>
